<compile_context>
chip_gen: v5e
topology: v5e:2x2
jax: 0.10.0
libtpu: 0.0.40
codegen_flags: <defaults>
</compile_context>

<pallas_src>
import functools
from typing import List

import jax
import jax.numpy as jnp
from jax.experimental import pallas as pl
from jax.experimental.pallas import tpu as pltpu

LANE = 128


def _round_up(x: int, m: int) -> int:
    return ((x + m - 1) // m) * m


# ----------------------------------------------------------------------------
# Parameter initialization (deterministic, PyTorch-Linear-like uniform init)
# ----------------------------------------------------------------------------
def _init_linear(key, in_dim: int, out_dim: int):
    kw, kb = jax.random.split(key)
    bound = 1.0 / jnp.sqrt(jnp.float32(in_dim))
    w = jax.random.uniform(kw, (in_dim, out_dim), jnp.float32, -bound, bound)
    b = jax.random.uniform(kb, (out_dim,), jnp.float32, -bound, bound)
    return w, b


def init_vae_params(key, input_dim: int, hidden_dims: List[int], z_dim: int):
    """Flat list [W, b, W, b, ...] in the order:
       encoder hidden layers, encoder mean, encoder log_std,
       decoder hidden layers, decoder mean, decoder log_std."""
    n_hidden = len(hidden_dims)
    keys = jax.random.split(key, 2 * (n_hidden + 2))
    ki = 0
    flat = []

    enc_arch = [input_dim] + hidden_dims
    for i in range(len(enc_arch) - 1):
        w, b = _init_linear(keys[ki], enc_arch[i], enc_arch[i + 1]); ki += 1
        flat += [w, b]
    w, b = _init_linear(keys[ki], enc_arch[-1], z_dim); ki += 1; flat += [w, b]   # enc mean
    w, b = _init_linear(keys[ki], enc_arch[-1], z_dim); ki += 1; flat += [w, b]   # enc log_std

    dec_arch = [z_dim] + hidden_dims
    for i in range(len(dec_arch) - 1):
        w, b = _init_linear(keys[ki], dec_arch[i], dec_arch[i + 1]); ki += 1
        flat += [w, b]
    w, b = _init_linear(keys[ki], dec_arch[-1], input_dim); ki += 1; flat += [w, b]  # dec mean
    w, b = _init_linear(keys[ki], dec_arch[-1], input_dim); ki += 1; flat += [w, b]  # dec log_std
    return flat


# ----------------------------------------------------------------------------
# Host-side packing (done ONCE): every layer becomes a full (128,128) tile.
# Layer i lives at rows [i*128:(i+1)*128] of w_slab; bias i is b_slab[i, :].
# Padded rows/cols are zero, so padded activation lanes never contaminate the
# next matmul.
# ----------------------------------------------------------------------------
def pack_vae_params(params, input_dim: int, hidden_dims: List[int], z_dim: int):
    assert input_dim <= LANE and z_dim <= LANE
    assert all(h <= LANE for h in hidden_dims), "hidden dims must fit in 128 lanes"

    pairs = [(params[2 * i], params[2 * i + 1]) for i in range(len(params) // 2)]
    n_layers = len(pairs)                       # 2 * (n_hidden + 2)

    w_slab = jnp.zeros((n_layers * LANE, LANE), jnp.float32)
    b_slab = jnp.zeros((_round_up(n_layers, 8), LANE), jnp.float32)
    for i, (w, b) in enumerate(pairs):
        in_dim, out_dim = w.shape
        assert in_dim <= LANE and out_dim <= LANE
        w_slab = w_slab.at[i * LANE:i * LANE + in_dim, :out_dim].set(
            w.astype(jnp.float32))
        b_slab = b_slab.at[i, :out_dim].set(b.astype(jnp.float32))
    return w_slab, b_slab


# ----------------------------------------------------------------------------
# Pallas kernel: whole VAE forward + losses (single invocation, all in VMEM)
# ----------------------------------------------------------------------------
def vae_kernel(xe_ref, w_ref, b_ref, out_ref, *, n_hidden: int, input_dim: int,
               z_dim: int, reconstr_error_weight: float, mse_loss: bool):
    B = out_ref.shape[0]

    # Sublane-packed inputs: rows 0:B = x, rows B:2B = eps (both lane-0 aligned).
    x = xe_ref[0:B, :]                               # (B, 128)
    eps = xe_ref[B:2 * B, :]                         # (B, 128)

    def linear(h, li):
        # Full-tile matmul: no sub-128 lane slicing, rows are 128-aligned.
        w = w_ref[li * LANE:(li + 1) * LANE, :]      # (128, 128), static slice
        b = b_ref[li:li + 1, :]                      # (1, 128)
        return jnp.dot(h, w, preferred_element_type=jnp.float32) + b

    def sig(v):
        # sigmoid via tanh: one EUP op, no divide.
        return 0.5 * jnp.tanh(0.5 * v) + 0.5

    # ---- Encoder ----
    h = x
    for i in range(n_hidden):
        h = sig(linear(h, i))
    mean = linear(h, n_hidden)                       # lanes [0:z_dim], rest 0
    std = sig(linear(h, n_hidden + 1))               # lanes [0:z_dim], rest 0.5

    # ---- Reparameterize (eps padded lanes are 0, so z padded lanes are 0) ----
    z = mean + eps * std

    # ---- Decoder ----
    hd = z
    off = n_hidden + 2
    for i in range(n_hidden):
        hd = sig(linear(hd, off + i))
    out_mean = linear(hd, off + n_hidden)            # lanes [0:input_dim], rest 0

    lane = jax.lax.broadcasted_iota(jnp.int32, (B, LANE), 1)

    # ---- Reconstruction error ----
    if mse_loss:
        diff = out_mean - x                          # padded lanes: 0 - 0 = 0
        reconstr_error = jnp.sum(diff * diff, axis=1, keepdims=True) * (
            1.0 / float(input_dim))                  # (B,1)
    else:
        out_log_std = linear(hd, off + n_hidden + 1)
        # out_std = sqrt(exp(log_std)) =>  log(out_std) = 0.5*log_std,
        #                                   1/out_std^2 = exp(-log_std)
        log2pi = jnp.float32(jnp.log(2.0 * jnp.pi))
        logp = (-0.5 * (x - out_mean) ** 2 * jnp.exp(-out_log_std)
                - 0.5 * out_log_std - 0.5 * log2pi)
        logp = jnp.where(lane < input_dim, logp, 0.0)
        reconstr_error = -jnp.sum(logp, axis=1, keepdims=True)               # (B,1)

    # ---- KL term (exactly as written in the reference module) ----
    kl_terms = std - 1.0 - jnp.log(std) + mean * mean
    kl_terms = jnp.where(lane < z_dim, kl_terms, 0.0)
    kl = 0.5 * jnp.sum(kl_terms, axis=1, keepdims=True)                      # (B,1)

    # ---- Negative ELBO averaged over batch ----
    neg_elbo = jnp.mean(reconstr_error_weight * reconstr_error + kl)

    # ---- Single lane-dense output block: col0=re, col1=kl, col2=neg_elbo ----
    elbo_b = jnp.broadcast_to(neg_elbo, (B, LANE))
    out = jnp.where(lane == 0, reconstr_error,
                    jnp.where(lane == 1, kl,
                              jnp.where(lane == 2, elbo_b, jnp.float32(0.0))))
    out_ref[...] = out


# ----------------------------------------------------------------------------
# Jitted wrapper: slabs are passed in pre-packed; config is static.
# ----------------------------------------------------------------------------
@functools.partial(
    jax.jit,
    static_argnames=("n_hidden", "input_dim", "z_dim",
                     "reconstr_error_weight", "mse_loss"))
def vae_forward_packed(x, eps, w_slab, b_slab, *, n_hidden: int, input_dim: int,
                       z_dim: int, reconstr_error_weight: float,
                       mse_loss: bool = True):
    B = x.shape[0]

    # Pack x and eps as two sublane blocks of one lane-dense slab (fused by XLA
    # inside this jit into a single cheap pad/concat fusion).
    x_pad = jnp.pad(x.astype(jnp.float32), ((0, 0), (0, LANE - input_dim)))
    eps_pad = jnp.pad(eps.astype(jnp.float32), ((0, 0), (0, LANE - z_dim)))
    xe = jnp.concatenate([x_pad, eps_pad], axis=0)                # (2B, 128)

    kernel = functools.partial(
        vae_kernel,
        n_hidden=n_hidden,
        input_dim=input_dim,
        z_dim=z_dim,
        reconstr_error_weight=float(reconstr_error_weight),
        mse_loss=bool(mse_loss),
    )

    vmem = pl.BlockSpec(memory_space=pltpu.MemorySpace.VMEM)
    out = pl.pallas_call(
        kernel,
        out_shape=jax.ShapeDtypeStruct((B, LANE), jnp.float32),
        in_specs=[vmem, vmem, vmem],
        out_specs=vmem,
    )(xe, w_slab, b_slab)

    return out[:, 0], out[:, 1], out[0, 2]


# ----------------------------------------------------------------------------
# Pure-JAX reference (mirrors the PyTorch module exactly)
# ----------------------------------------------------------------------------
def vae_forward_ref(x, eps, params, n_hidden, w, mse_loss=True):
    pairs = [(params[2 * i], params[2 * i + 1]) for i in range(len(params) // 2)]
    enc = pairs[:n_hidden + 2]
    dec = pairs[n_hidden + 2:]

    h = x.astype(jnp.float32)
    for i in range(n_hidden):
        h = jax.nn.sigmoid(h @ enc[i][0] + enc[i][1])
    mean = h @ enc[n_hidden][0] + enc[n_hidden][1]
    std = jax.nn.sigmoid(h @ enc[n_hidden + 1][0] + enc[n_hidden + 1][1])
    z = mean + eps * std
    hd = z
    for i in range(n_hidden):
        hd = jax.nn.sigmoid(hd @ dec[i][0] + dec[i][1])
    out_mean = hd @ dec[n_hidden][0] + dec[n_hidden][1]
    out_log_std = hd @ dec[n_hidden + 1][0] + dec[n_hidden + 1][1]
    out_std = jnp.sqrt(jnp.exp(out_log_std))
    if mse_loss:
        re = jnp.mean((out_mean - x) ** 2, axis=1)
    else:
        logp = (-0.5 * ((x - out_mean) / out_std) ** 2 - jnp.log(out_std)
                - 0.5 * jnp.log(2.0 * jnp.pi))
        re = -jnp.sum(logp, axis=1)
    kl = 0.5 * jnp.sum(std - 1.0 - jnp.log(std) + mean * mean, axis=1)
    neg_elbo = jnp.mean(w * re + kl)
    return re, kl, neg_elbo


# ----------------------------------------------------------------------------
if __name__ == "__main__":
    B = 8
    INPUT_DIM = 16
    HIDDEN_DIMS = [32, 32]
    Z_DIM = 8
    RECONSTR_ERROR_WEIGHT = 0.5

    key = jax.random.PRNGKey(0)
    k_x, k_eps, k_params = jax.random.split(key, 3)

    x = jax.random.normal(k_x, (B, INPUT_DIM), jnp.float32)
    # eps = torch.randn(mean.shape) in the reference; generated host-side here so
    # the kernel stays deterministic and checkable against the pure-JAX reference.
    eps = jax.random.normal(k_eps, (B, Z_DIM), jnp.float32)
    params = init_vae_params(k_params, INPUT_DIM, HIDDEN_DIMS, Z_DIM)

    # Pack parameter slabs ONCE (hoisted out of the per-call path).
    w_slab, b_slab = jax.block_until_ready(
        pack_vae_params(params, INPUT_DIM, HIDDEN_DIMS, Z_DIM))

    for use_mse in (True, False):
        re, kl, neg_elbo = vae_forward_packed(
            x, eps, w_slab, b_slab,
            n_hidden=len(HIDDEN_DIMS), input_dim=INPUT_DIM, z_dim=Z_DIM,
            reconstr_error_weight=RECONSTR_ERROR_WEIGHT, mse_loss=use_mse)
        jax.block_until_ready((re, kl, neg_elbo))

        re_r, kl_r, elbo_r = vae_forward_ref(
            x, eps, params, len(HIDDEN_DIMS), RECONSTR_ERROR_WEIGHT,
            mse_loss=use_mse)
        assert jnp.allclose(re, re_r, atol=1e-4, rtol=1e-4), ("re", use_mse)
        assert jnp.allclose(kl, kl_r, atol=1e-4, rtol=1e-4), ("kl", use_mse)
        assert jnp.allclose(neg_elbo, elbo_r, atol=1e-4, rtol=1e-4), ("elbo", use_mse)

    print("KERNEL_OK")
</pallas_src>

<mosaic_0001>
module attributes {stable_mosaic.version = 11 : i64} {
  func.func @vae_kernel(%arg0: memref<16x128xf32, #tpu.memory_space<vmem>>, %arg1: memref<1024x128xf32, #tpu.memory_space<vmem>>, %arg2: memref<8x128xf32, #tpu.memory_space<vmem>>, %arg3: memref<8x128xf32, #tpu.memory_space<vmem>>) attributes {dimension_semantics = [], scalar_prefetch = 0 : i64, scratch_operands = 0 : i64, tpu.core_type = #tpu.core_type<tc>} {
    %c0 = arith.constant 0 : index
    %c0_0 = arith.constant 0 : index
    %0 = vector.load %arg0[%c0, %c0_0] : memref<16x128xf32, #tpu.memory_space<vmem>>, vector<8x128xf32>
    %c8 = arith.constant 8 : index
    %c0_1 = arith.constant 0 : index
    %1 = vector.load %arg0[%c8, %c0_1] : memref<16x128xf32, #tpu.memory_space<vmem>>, vector<8x128xf32>
    %c0_2 = arith.constant 0 : index
    %c0_3 = arith.constant 0 : index
    %2 = vector.load %arg1[%c0_2, %c0_3] : memref<1024x128xf32, #tpu.memory_space<vmem>>, vector<128x128xf32>
    %c0_4 = arith.constant 0 : index
    %c0_5 = arith.constant 0 : index
    %3 = vector.load %arg2[%c0_4, %c0_5] : memref<8x128xf32, #tpu.memory_space<vmem>>, vector<1x128xf32>
    %cst = arith.constant dense<0.000000e+00> : vector<8x128xf32>
    %4 = tpu.matmul %0, %2, %cst {dimension_numbers = #tpu.dot_dimension_numbers<[1], [0], [0], [1], [0, 0, 1, 1], [], []>} : vector<8x128xf32>, vector<128x128xf32>, vector<8x128xf32> -> vector<8x128xf32>
    %5 = vector.broadcast %3 : vector<1x128xf32> to vector<8x128xf32>
    %6 = arith.addf %4, %5 : vector<8x128xf32>
    %cst_6 = arith.constant 5.000000e-01 : f32
    %7 = vector.broadcast %cst_6 : f32 to vector<8x128xf32>
    %8 = arith.mulf %7, %6 : vector<8x128xf32>
    %9 = math.tanh %8 : vector<8x128xf32>
    %cst_7 = arith.constant 5.000000e-01 : f32
    %10 = vector.broadcast %cst_7 : f32 to vector<8x128xf32>
    %11 = arith.mulf %10, %9 : vector<8x128xf32>
    %cst_8 = arith.constant 5.000000e-01 : f32
    %12 = vector.broadcast %cst_8 : f32 to vector<8x128xf32>
    %13 = arith.addf %11, %12 : vector<8x128xf32>
    %c128 = arith.constant 128 : index
    %c0_9 = arith.constant 0 : index
    %14 = vector.load %arg1[%c128, %c0_9] : memref<1024x128xf32, #tpu.memory_space<vmem>>, vector<128x128xf32>
    %c1 = arith.constant 1 : index
    %c0_10 = arith.constant 0 : index
    %15 = vector.load %arg2[%c1, %c0_10] : memref<8x128xf32, #tpu.memory_space<vmem>>, vector<1x128xf32>
    %cst_11 = arith.constant dense<0.000000e+00> : vector<8x128xf32>
    %16 = tpu.matmul %13, %14, %cst_11 {dimension_numbers = #tpu.dot_dimension_numbers<[1], [0], [0], [1], [0, 0, 1, 1], [], []>} : vector<8x128xf32>, vector<128x128xf32>, vector<8x128xf32> -> vector<8x128xf32>
    %17 = vector.broadcast %15 : vector<1x128xf32> to vector<8x128xf32>
    %18 = arith.addf %16, %17 : vector<8x128xf32>
    %cst_12 = arith.constant 5.000000e-01 : f32
    %19 = vector.broadcast %cst_12 : f32 to vector<8x128xf32>
    %20 = arith.mulf %19, %18 : vector<8x128xf32>
    %21 = math.tanh %20 : vector<8x128xf32>
    %cst_13 = arith.constant 5.000000e-01 : f32
    %22 = vector.broadcast %cst_13 : f32 to vector<8x128xf32>
    %23 = arith.mulf %22, %21 : vector<8x128xf32>
    %cst_14 = arith.constant 5.000000e-01 : f32
    %24 = vector.broadcast %cst_14 : f32 to vector<8x128xf32>
    %25 = arith.addf %23, %24 : vector<8x128xf32>
    %c256 = arith.constant 256 : index
    %c0_15 = arith.constant 0 : index
    %26 = vector.load %arg1[%c256, %c0_15] : memref<1024x128xf32, #tpu.memory_space<vmem>>, vector<128x128xf32>
    %c2 = arith.constant 2 : index
    %c0_16 = arith.constant 0 : index
    %27 = vector.load %arg2[%c2, %c0_16] : memref<8x128xf32, #tpu.memory_space<vmem>>, vector<1x128xf32>
    %cst_17 = arith.constant dense<0.000000e+00> : vector<8x128xf32>
    %28 = tpu.matmul %25, %26, %cst_17 {dimension_numbers = #tpu.dot_dimension_numbers<[1], [0], [0], [1], [0, 0, 1, 1], [], []>} : vector<8x128xf32>, vector<128x128xf32>, vector<8x128xf32> -> vector<8x128xf32>
    %29 = vector.broadcast %27 : vector<1x128xf32> to vector<8x128xf32>
    %30 = arith.addf %28, %29 : vector<8x128xf32>
    %c384 = arith.constant 384 : index
    %c0_18 = arith.constant 0 : index
    %31 = vector.load %arg1[%c384, %c0_18] : memref<1024x128xf32, #tpu.memory_space<vmem>>, vector<128x128xf32>
    %c3 = arith.constant 3 : index
    %c0_19 = arith.constant 0 : index
    %32 = vector.load %arg2[%c3, %c0_19] : memref<8x128xf32, #tpu.memory_space<vmem>>, vector<1x128xf32>
    %cst_20 = arith.constant dense<0.000000e+00> : vector<8x128xf32>
    %33 = tpu.matmul %25, %31, %cst_20 {dimension_numbers = #tpu.dot_dimension_numbers<[1], [0], [0], [1], [0, 0, 1, 1], [], []>} : vector<8x128xf32>, vector<128x128xf32>, vector<8x128xf32> -> vector<8x128xf32>
    %34 = vector.broadcast %32 : vector<1x128xf32> to vector<8x128xf32>
    %35 = arith.addf %33, %34 : vector<8x128xf32>
    %cst_21 = arith.constant 5.000000e-01 : f32
    %36 = vector.broadcast %cst_21 : f32 to vector<8x128xf32>
    %37 = arith.mulf %36, %35 : vector<8x128xf32>
    %38 = math.tanh %37 : vector<8x128xf32>
    %cst_22 = arith.constant 5.000000e-01 : f32
    %39 = vector.broadcast %cst_22 : f32 to vector<8x128xf32>
    %40 = arith.mulf %39, %38 : vector<8x128xf32>
    %cst_23 = arith.constant 5.000000e-01 : f32
    %41 = vector.broadcast %cst_23 : f32 to vector<8x128xf32>
    %42 = arith.addf %40, %41 : vector<8x128xf32>
    %43 = arith.mulf %1, %42 : vector<8x128xf32>
    %44 = arith.addf %30, %43 : vector<8x128xf32>
    %c512 = arith.constant 512 : index
    %c0_24 = arith.constant 0 : index
    %45 = vector.load %arg1[%c512, %c0_24] : memref<1024x128xf32, #tpu.memory_space<vmem>>, vector<128x128xf32>
    %c4 = arith.constant 4 : index
    %c0_25 = arith.constant 0 : index
    %46 = vector.load %arg2[%c4, %c0_25] : memref<8x128xf32, #tpu.memory_space<vmem>>, vector<1x128xf32>
    %cst_26 = arith.constant dense<0.000000e+00> : vector<8x128xf32>
    %47 = tpu.matmul %44, %45, %cst_26 {dimension_numbers = #tpu.dot_dimension_numbers<[1], [0], [0], [1], [0, 0, 1, 1], [], []>} : vector<8x128xf32>, vector<128x128xf32>, vector<8x128xf32> -> vector<8x128xf32>
    %48 = vector.broadcast %46 : vector<1x128xf32> to vector<8x128xf32>
    %49 = arith.addf %47, %48 : vector<8x128xf32>
    %cst_27 = arith.constant 5.000000e-01 : f32
    %50 = vector.broadcast %cst_27 : f32 to vector<8x128xf32>
    %51 = arith.mulf %50, %49 : vector<8x128xf32>
    %52 = math.tanh %51 : vector<8x128xf32>
    %cst_28 = arith.constant 5.000000e-01 : f32
    %53 = vector.broadcast %cst_28 : f32 to vector<8x128xf32>
    %54 = arith.mulf %53, %52 : vector<8x128xf32>
    %cst_29 = arith.constant 5.000000e-01 : f32
    %55 = vector.broadcast %cst_29 : f32 to vector<8x128xf32>
    %56 = arith.addf %54, %55 : vector<8x128xf32>
    %c640 = arith.constant 640 : index
    %c0_30 = arith.constant 0 : index
    %57 = vector.load %arg1[%c640, %c0_30] : memref<1024x128xf32, #tpu.memory_space<vmem>>, vector<128x128xf32>
    %c5 = arith.constant 5 : index
    %c0_31 = arith.constant 0 : index
    %58 = vector.load %arg2[%c5, %c0_31] : memref<8x128xf32, #tpu.memory_space<vmem>>, vector<1x128xf32>
    %cst_32 = arith.constant dense<0.000000e+00> : vector<8x128xf32>
    %59 = tpu.matmul %56, %57, %cst_32 {dimension_numbers = #tpu.dot_dimension_numbers<[1], [0], [0], [1], [0, 0, 1, 1], [], []>} : vector<8x128xf32>, vector<128x128xf32>, vector<8x128xf32> -> vector<8x128xf32>
    %60 = vector.broadcast %58 : vector<1x128xf32> to vector<8x128xf32>
    %61 = arith.addf %59, %60 : vector<8x128xf32>
    %cst_33 = arith.constant 5.000000e-01 : f32
    %62 = vector.broadcast %cst_33 : f32 to vector<8x128xf32>
    %63 = arith.mulf %62, %61 : vector<8x128xf32>
    %64 = math.tanh %63 : vector<8x128xf32>
    %cst_34 = arith.constant 5.000000e-01 : f32
    %65 = vector.broadcast %cst_34 : f32 to vector<8x128xf32>
    %66 = arith.mulf %65, %64 : vector<8x128xf32>
    %cst_35 = arith.constant 5.000000e-01 : f32
    %67 = vector.broadcast %cst_35 : f32 to vector<8x128xf32>
    %68 = arith.addf %66, %67 : vector<8x128xf32>
    %c768 = arith.constant 768 : index
    %c0_36 = arith.constant 0 : index
    %69 = vector.load %arg1[%c768, %c0_36] : memref<1024x128xf32, #tpu.memory_space<vmem>>, vector<128x128xf32>
    %c6 = arith.constant 6 : index
    %c0_37 = arith.constant 0 : index
    %70 = vector.load %arg2[%c6, %c0_37] : memref<8x128xf32, #tpu.memory_space<vmem>>, vector<1x128xf32>
    %cst_38 = arith.constant dense<0.000000e+00> : vector<8x128xf32>
    %71 = tpu.matmul %68, %69, %cst_38 {dimension_numbers = #tpu.dot_dimension_numbers<[1], [0], [0], [1], [0, 0, 1, 1], [], []>} : vector<8x128xf32>, vector<128x128xf32>, vector<8x128xf32> -> vector<8x128xf32>
    %72 = vector.broadcast %70 : vector<1x128xf32> to vector<8x128xf32>
    %73 = arith.addf %71, %72 : vector<8x128xf32>
    %74 = tpu.iota {dimensions = array<i32: 1>} : vector<8x128xi32>
    %75 = arith.subf %73, %0 : vector<8x128xf32>
    %76 = arith.mulf %75, %75 : vector<8x128xf32>
    %cst_39 = arith.constant dense<0.000000e+00> : vector<8xf32>
    %77 = vector.multi_reduction <add>, %76, %cst_39 [1] : vector<8x128xf32> to vector<8xf32>
    %78 = vector.shape_cast %77 : vector<8xf32> to vector<8x1xf32>
    %cst_40 = arith.constant 6.250000e-02 : f32
    %79 = vector.broadcast %cst_40 : f32 to vector<8x1xf32>
    %80 = arith.mulf %78, %79 : vector<8x1xf32>
    %cst_41 = arith.constant 1.000000e+00 : f32
    %81 = vector.broadcast %cst_41 : f32 to vector<8x128xf32>
    %82 = arith.subf %42, %81 : vector<8x128xf32>
    %83 = math.log %42 : vector<8x128xf32>
    %84 = arith.subf %82, %83 : vector<8x128xf32>
    %85 = arith.mulf %30, %30 : vector<8x128xf32>
    %86 = arith.addf %84, %85 : vector<8x128xf32>
    %c8_i32 = arith.constant 8 : i32
    %87 = vector.broadcast %c8_i32 : i32 to vector<8x128xi32>
    %88 = arith.cmpi slt, %74, %87 : vector<8x128xi32>
    %cst_42 = arith.constant 0.000000e+00 : f32
    %89 = vector.broadcast %cst_42 : f32 to vector<8x128xf32>
    %90 = arith.select %88, %86, %89 : vector<8x128xi1>, vector<8x128xf32>
    %cst_43 = arith.constant dense<0.000000e+00> : vector<8xf32>
    %91 = vector.multi_reduction <add>, %90, %cst_43 [1] : vector<8x128xf32> to vector<8xf32>
    %92 = vector.shape_cast %91 : vector<8xf32> to vector<8x1xf32>
    %cst_44 = arith.constant 5.000000e-01 : f32
    %93 = vector.broadcast %cst_44 : f32 to vector<8x1xf32>
    %94 = arith.mulf %93, %92 : vector<8x1xf32>
    %cst_45 = arith.constant 5.000000e-01 : f32
    %95 = vector.broadcast %cst_45 : f32 to vector<8x1xf32>
    %96 = arith.mulf %95, %80 : vector<8x1xf32>
    %97 = arith.addf %96, %94 : vector<8x1xf32>
    %98 = vector.shape_cast %97 : vector<8x1xf32> to vector<1x8x1xf32>
    %cst_46 = arith.constant dense<0.000000e+00> : vector<1xf32>
    %99 = vector.multi_reduction <add>, %98, %cst_46 [1, 2] : vector<1x8x1xf32> to vector<1xf32>
    %100 = vector.shape_cast %99 : vector<1xf32> to vector<1x1x1xf32>
    %101 = vector.extract %100[0, 0, 0] : f32 from vector<1x1x1xf32>
    %cst_47 = arith.constant 8.000000e+00 : f32
    %102 = arith.divf %101, %cst_47 : f32
    %103 = vector.broadcast %102 : f32 to vector<8x128xf32>
    %c0_i32 = arith.constant 0 : i32
    %104 = vector.broadcast %c0_i32 : i32 to vector<8x128xi32>
    %105 = arith.cmpi eq, %74, %104 : vector<8x128xi32>
    %c1_i32 = arith.constant 1 : i32
    %106 = vector.broadcast %c1_i32 : i32 to vector<8x128xi32>
    %107 = arith.cmpi eq, %74, %106 : vector<8x128xi32>
    %c2_i32 = arith.constant 2 : i32
    %108 = vector.broadcast %c2_i32 : i32 to vector<8x128xi32>
    %109 = arith.cmpi eq, %74, %108 : vector<8x128xi32>
    %cst_48 = arith.constant 0.000000e+00 : f32
    %110 = vector.broadcast %cst_48 : f32 to vector<8x128xf32>
    %111 = arith.select %109, %103, %110 : vector<8x128xi1>, vector<8x128xf32>
    %112 = vector.shape_cast %94 : vector<8x1xf32> to vector<8x1xf32>
    %113 = vector.broadcast %112 : vector<8x1xf32> to vector<8x128xf32>
    %114 = arith.select %107, %113, %111 : vector<8x128xi1>, vector<8x128xf32>
    %115 = vector.shape_cast %80 : vector<8x1xf32> to vector<8x1xf32>
    %116 = vector.broadcast %115 : vector<8x1xf32> to vector<8x128xf32>
    %117 = arith.select %105, %116, %114 : vector<8x128xi1>, vector<8x128xf32>
    %c0_49 = arith.constant 0 : index
    %c0_50 = arith.constant 0 : index
    %118 = vector.load %arg3[%c0_49, %c0_50] : memref<8x128xf32, #tpu.memory_space<vmem>>, vector<8x128xf32>
    tpu.vector_store %arg3[%c0_49, %c0_50], %117 {strides = array<i32>} : memref<8x128xf32, #tpu.memory_space<vmem>>, vector<8x128xf32>,
    return
  }
}

</mosaic_0001>

<bundles_post_ra>
// kernel: vae_forward_packed.1
= control target key start
LH: loop header
LB: loop body
LE: loop exit
PB: predicated region body
PF: predicated region fallthrough
CT: control target
= control target key end

     0   :  { %8 = vsyncpa [#allocation3], 0  ;;  %s429_s15 = smov [#allocation2]   ;;  %s430_s17 = smov 128   ;;  %s493_s0 = inlined_call_operand.vmem [shape: f32[16,128], index: 0, kind: input, shape index: {}]   ;;  %s494_s1 = inlined_call_operand.hbm [shape: f32[1024,128], index: 1, kind: input, shape index: {}]   ;;  %s495_s2 = inlined_call_operand.vmem [shape: f32[8,128], index: 2, kind: input, shape index: {}]   ;;  %s496_s3 = inlined_call_operand.vmem [shape: f32[8,128], index: 3, kind: output, shape index: {}]  }
   0x1   :  { %s15_s14 = sshll.u32 %s494_s1, 4  ;;  %s17_s16 = sshll.u32 %s429_s15, 4  ;;  %s16_s14 = int_to_ptr.hbm [resolvable:$true] %s15_s14  ;;  %s18_s16 = int_to_ptr.vmem [resolvable:$true] %s17_s16 }
   0x2   :  { %s431_s18 = smov 8  }
   0x3   :  { %23 = dma.hbm_to_vmem [thread:$0]  %s16_s14, 16384, %s18_s16, [#allocation3], %s430_s17, %s430_s17, %s431_s18  }
   0x4   :  { %427 = dma.done.wait [#allocation3], 16384  }
   0x5   :  { %428 = vsyncadd [#allocation3], 4294950912  ;;  %v47_v0 = vld [vmem:[#allocation2 + $0x78] sm:$0xff]  ;;  %v46_v1 = vld [vmem:[#allocation2 + $0x70] sm:$0xff]  ;;  %vm340_vm1 = vcmask 7168  }
   0x6   :  { %50 = vmatpush.msra.mxu0 %v47_v0  ;;  %v45_v2 = vld [vmem:[#allocation2 + $0x68] sm:$0xff]  ;;  %v44_v3 = vld [vmem:[#allocation2 + $0x60] sm:$0xff]  ;;  %v89_v4 = vld [vmem:[#allocation2 + $0xf8] sm:$0xff] }
   0x7   :  { %v43_v5 = vld [vmem:[#allocation2 + $0x58] sm:$0xff]  ;;  %92 = vmatpush.msra.mxu1 %v89_v4  ;;  %v88_v6 = vld [vmem:[#allocation2 + $0xf0] sm:$0xff]  ;;  %v87_v8 = vld [vmem:[#allocation2 + $0xe8] sm:$0xff] }
   0x8   :  { %51 = vmatpush.msra.mxu0 %v46_v1  ;;  %v42_v7 = vld [vmem:[#allocation2 + $0x50] sm:$0xff]  ;;  %v41_v9 = vld [vmem:[#allocation2 + $0x48] sm:$0xff]  ;;  %v86_v10 = vld [vmem:[#allocation2 + $0xe0] sm:$0xff] }
   0x9   :  { %93 = vmatpush.msra.mxu1 %v88_v6  ;;  %v85_v11 = vld [vmem:[#allocation2 + $0xd8] sm:$0xff]  ;;  %v40_v12 = vld [vmem:[#allocation2 + $0x40] sm:$0xff]  ;;  %v84_v13 = vld [vmem:[#allocation2 + $0xd0] sm:$0xff] }
   0xa   :  { %52 = vmatpush.msra.mxu0 %v45_v2  ;;  %v39_v14 = vld [vmem:[#allocation2 + $0x38] sm:$0xff]  ;;  %v83_v15 = vld [vmem:[#allocation2 + $0xc8] sm:$0xff]  ;;  %v38_v16 = vld [vmem:[#allocation2 + $0x30] sm:$0xff] }
   0xb   :  { %94 = vmatpush.msra.mxu1 %v87_v8  ;;  %v82_v17 = vld [vmem:[#allocation2 + $0xc0] sm:$0xff]  ;;  %v37_v18 = vld [vmem:[#allocation2 + $0x28] sm:$0xff]  ;;  %v35_v20 = vld [vmem:[#allocation2 + $0x18] sm:$0xff] }
   0xc   :  { %53 = vmatpush.msra.mxu0 %v44_v3  ;;  %v36_v19 = vld [vmem:[#allocation2 + $0x20] sm:$0xff]  ;;  %v34_v21 = vld [vmem:[#allocation2 + $0x10] sm:$0xff]  ;;  %v33_v22 = vld [vmem:[#allocation2 + $0x8] sm:$0xff] }
   0xd   :  { %95 = vmatpush.msra.mxu1 %v86_v10  ;;  %v32_v23 = vld [vmem:[#allocation2] sm:$0xff]  ;;  %v81_v25 = vld [vmem:[#allocation2 + $0xb8] sm:$0xff]  ;;  %v80_v26 = vld [vmem:[#allocation2 + $0xb0] sm:$0xff] }
   0xe   :  { %54 = vmatpush.msra.mxu0 %v43_v5  ;;  %v459_v24 = vld [vmem:[%s493_s0] sm:$0xff]  ;;  %v79_v27 = vld [vmem:[#allocation2 + $0xa8] sm:$0xff]  ;;  %v77_v29 = vld [vmem:[#allocation2 + $0x98] sm:$0xff] }
   0xf   :  { %96 = vmatpush.msra.mxu1 %v85_v11  ;;  %v78_v28 = vld [vmem:[#allocation2 + $0xa0] sm:$0xff]  ;;  %v76_v30 = vld [vmem:[#allocation2 + $0x90] sm:$0xff]  ;;  %v75_v31 = vld [vmem:[#allocation2 + $0x88] sm:$0xff] }
  0x10   :  { %55 = vmatpush.msra.mxu0 %v42_v7  ;;  %v74_v32 = vld [vmem:[#allocation2 + $0x80] sm:$0xff]  ;;  %v131_v33 = vld [vmem:[#allocation2 + $0x178] sm:$0xff]  ;;  %v130_v35 = vld [vmem:[#allocation2 + $0x170] sm:$0xff] }
  0x11   :  { %97 = vmatpush.msra.mxu1 %v84_v13  ;;  %v169_v34 = vld [vmem:[#allocation2 + $0x1f8] sm:$0xff]  ;;  %134 = vmatpush.msra.mxu2 %v131_v33  ;;  %v168_v36 = vld [vmem:[#allocation2 + $0x1f0] sm:$0xff]  ;;  %v129_v37 = vld [vmem:[#allocation2 + $0x168] sm:$0xff] }
  0x12   :  { %56 = vmatpush.msra.mxu0 %v41_v9  ;;  %172 = vmatpush.msra.mxu3 %v169_v34  ;;  %v167_v38 = vld [vmem:[#allocation2 + $0x1e8] sm:$0xff]  ;;  %v128_v39 = vld [vmem:[#allocation2 + $0x160] sm:$0xff]  ;;  %v127_v41 = vld [vmem:[#allocation2 + $0x158] sm:$0xff] }
  0x13   :  { %98 = vmatpush.msra.mxu1 %v83_v15  ;;  %135 = vmatpush.msra.mxu2 %v130_v35  ;;  %v166_v40 = vld [vmem:[#allocation2 + $0x1e0] sm:$0xff]  ;;  %v165_v42 = vld [vmem:[#allocation2 + $0x1d8] sm:$0xff]  ;;  %v126_v43 = vld [vmem:[#allocation2 + $0x150] sm:$0xff] }
  0x14   :  { %57 = vmatpush.msra.mxu0 %v40_v12  ;;  %173 = vmatpush.msra.mxu3 %v168_v36  ;;  %v164_v44 = vld [vmem:[#allocation2 + $0x1d0] sm:$0xff]  ;;  %v125_v45 = vld [vmem:[#allocation2 + $0x148] sm:$0xff]  ;;  %v124_v47 = vld [vmem:[#allocation2 + $0x140] sm:$0xff] }
  0x15   :  { %99 = vmatpush.msra.mxu1 %v82_v17  ;;  %136 = vmatpush.msra.mxu2 %v129_v37  ;;  %v163_v46 = vld [vmem:[#allocation2 + $0x1c8] sm:$0xff]  ;;  %v162_v48 = vld [vmem:[#allocation2 + $0x1c0] sm:$0xff]  ;;  %v123_v56 = vld [vmem:[#allocation2 + $0x138] sm:$0xff] }
  0x16   :  { %58 = vmatpush.msra.mxu0 %v39_v14  ;;  %174 = vmatpush.msra.mxu3 %v167_v38  ;;  %v382_v49 = vld [vmem:[%s495_s2] ss:$0 sm:$0xff]  ;;  %v161_v57 = vld [vmem:[#allocation2 + $0x1b8] sm:$0xff]  ;;  %v122_v58 = vld [vmem:[#allocation2 + $0x130] sm:$0xff] }
  0x17   :  { %100 = vmatpush.msra.mxu1 %v81_v25  ;;  %137 = vmatpush.msra.mxu2 %v128_v39  ;;  %v160_v59 = vld [vmem:[#allocation2 + $0x1b0] sm:$0xff]  ;;  %v121_v60 = vld [vmem:[#allocation2 + $0x128] sm:$0xff]  ;;  %v120_v62 = vld [vmem:[#allocation2 + $0x120] sm:$0xff] }
  0x18   :  { %59 = vmatpush.msra.mxu0 %v38_v16  ;;  %175 = vmatpush.msra.mxu3 %v166_v40  ;;  %v159_v61 = vld [vmem:[#allocation2 + $0x1a8] sm:$0xff]  ;;  %v158_v63 = vld [vmem:[#allocation2 + $0x1a0] sm:$0xff]  ;;  %v119_v0 = vld [vmem:[#allocation2 + $0x118] sm:$0xff] }
  0x19   :  { %101 = vmatpush.msra.mxu1 %v80_v26  ;;  %138 = vmatpush.msra.mxu2 %v127_v41  ;;  %v157_v1 = vld [vmem:[#allocation2 + $0x198] sm:$0xff]  ;;  %v118_v2 = vld [vmem:[#allocation2 + $0x110] sm:$0xff]  ;;  %v117_v4 = vld [vmem:[#allocation2 + $0x108] sm:$0xff] }
  0x1a   :  { %60 = vmatpush.msra.mxu0 %v37_v18  ;;  %176 = vmatpush.msra.mxu3 %v165_v42  ;;  %v156_v3 = vld [vmem:[#allocation2 + $0x190] sm:$0xff]  ;;  %v155_v5 = vld [vmem:[#allocation2 + $0x188] sm:$0xff]  ;;  %v116_v6 = vld [vmem:[#allocation2 + $0x100] sm:$0xff] }
  0x1b   :  { %102 = vmatpush.msra.mxu1 %v79_v27  ;;  %139 = vmatpush.msra.mxu2 %v126_v43  ;;  %v154_v7 = vld [vmem:[#allocation2 + $0x180] sm:$0xff]  ;;  %v213_v8 = vld [vmem:[#allocation2 + $0x278] sm:$0xff]  ;;  %v212_v9 = vld [vmem:[#allocation2 + $0x270] sm:$0xff] }
  0x1c   :  { %61 = vmatpush.msra.mxu0 %v36_v19  ;;  %177 = vmatpush.msra.mxu3 %v164_v44  ;;  %v211_v10 = vld [vmem:[#allocation2 + $0x268] sm:$0xff]  ;;  %v210_v11 = vld [vmem:[#allocation2 + $0x260] sm:$0xff]  ;;  %v209_v12 = vld [vmem:[#allocation2 + $0x258] sm:$0xff] }
  0x1d   :  { %103 = vmatpush.msra.mxu1 %v78_v28  ;;  %140 = vmatpush.msra.mxu2 %v125_v45  ;;  %v208_v13 = vld [vmem:[#allocation2 + $0x250] sm:$0xff]  ;;  %v383_v14 = vld [vmem:[%s495_s2 + $0x1] ss:$0 sm:$0xff]  ;;  %v203_v26 = vld [vmem:[#allocation2 + $0x228] sm:$0xff] }
  0x1e   :  { %62 = vmatpush.msra.mxu0 %v35_v20  ;;  %178 = vmatpush.msra.mxu3 %v163_v46  ;;  %v204_v25 = vld [vmem:[#allocation2 + $0x230] sm:$0xff]  ;;  %v202_v27 = vld [vmem:[#allocation2 + $0x220] sm:$0xff]  ;;  %v201_v28 = vld [vmem:[#allocation2 + $0x218] sm:$0xff] }
  0x1f   :  { %104 = vmatpush.msra.mxu1 %v77_v29  ;;  %141 = vmatpush.msra.mxu2 %v124_v47  ;;  %v200_v29 = vld [vmem:[#allocation2 + $0x210] sm:$0xff]  ;;  %v253_v34 = vld [vmem:[#allocation2 + $0x2e8] sm:$0xff]  ;;  %v252_v35 = vld [vmem:[#allocation2 + $0x2e0] sm:$0xff] }
  0x20   :  { %63 = vmatpush.msra.mxu0 %v34_v21  ;;  %179 = vmatpush.msra.mxu3 %v162_v48  ;;  %v207_v21 = vld [vmem:[#allocation2 + $0x248] sm:$0xff]  ;;  %v254_v33 = vld [vmem:[#allocation2 + $0x2f0] sm:$0xff]  ;;  %v251_v36 = vld [vmem:[#allocation2 + $0x2d8] sm:$0xff] }
  0x21   :  { %105 = vmatpush.msra.mxu1 %v76_v30  ;;  %142 = vmatpush.msra.mxu2 %v123_v56  ;;  %v199_v30 = vld [vmem:[#allocation2 + $0x208] sm:$0xff]  ;;  %v250_v37 = vld [vmem:[#allocation2 + $0x2d0] sm:$0xff]  ;;  %v385_v38 = vld [vmem:[%s495_s2 + $0x3] ss:$0 sm:$0xff] }
  0x22   :  { %64 = vmatpush.msra.mxu0 %v33_v22  ;;  %180 = vmatpush.msra.mxu3 %v161_v57  ;;  %v206_v22 = vld [vmem:[#allocation2 + $0x240] sm:$0xff]  ;;  %v249_v39 = vld [vmem:[#allocation2 + $0x2c8] sm:$0xff] }
  0x23   :  { %106 = vmatpush.msra.mxu1 %v75_v31  ;;  %143 = vmatpush.msra.mxu2 %v122_v58  ;;  %v198_v31 = vld [vmem:[#allocation2 + $0x200] sm:$0xff]  ;;  %v31_v48 = vld [vmem:[%s493_s0 + $0x8] sm:$0xff] }
  0x24   :  { %65 = vmatpush.msra.mxu0 %v32_v23  ;;  %181 = vmatpush.msra.mxu3 %v160_v59  ;;  %v205_v23 = vld [vmem:[#allocation2 + $0x238] sm:$0xff]  ;;  %v248_v41 = vld [vmem:[#allocation2 + $0x2c0] sm:$0xff] }
  0x25   :  { %66 = vmatmul.f32.vlgmr.msra.gmra.mxu0 %v459_v24  ;;  %107 = vmatpush.msra.mxu1 %v74_v32  ;;  %v255_v32 = vld [vmem:[#allocation2 + $0x2f8] sm:$0xff]  ;;  %v384_v45 = vld [vmem:[%s495_s2 + $0x2] ss:$0 sm:$0xff] }
  0x26   :  { %144 = vmatpush.msra.mxu2 %v121_v60  ;;  %182 = vmatpush.msra.mxu3 %v159_v61  ;;  %v247_v59 = vld [vmem:[#allocation2 + $0x2b8] sm:$0xff]  ;;  %v246_v60 = vld [vmem:[#allocation2 + $0x2b0] sm:$0xff]  ;;  %v245_v61 = vld [vmem:[#allocation2 + $0x2a8] sm:$0xff] }
  0x27   :  { %216 = vmatpush.msrb.mxu0 %v213_v8  ;;  %258 = vmatpush.msrb.mxu1 %v255_v32  ;;  %v292_v8 = vld [vmem:[#allocation2 + $0x350] sm:$0xff] }
  0x28   :  { %145 = vmatpush.msra.mxu2 %v120_v62  ;;  %183 = vmatpush.msra.mxu3 %v158_v63  ;;  %v244_v62 = vld [vmem:[#allocation2 + $0x2a0] sm:$0xff]  ;;  %v243_v63 = vld [vmem:[#allocation2 + $0x298] sm:$0xff] }
  0x29   :  { %217 = vmatpush.msrb.mxu0 %v212_v9  ;;  %259 = vmatpush.msrb.mxu1 %v254_v33  ;;  %v291_v9 = vld [vmem:[#allocation2 + $0x348] sm:$0xff] }
  0x2a   :  { %146 = vmatpush.msra.mxu2 %v119_v0  ;;  %184 = vmatpush.msra.mxu3 %v157_v1  ;;  %v242_v0 = vld [vmem:[#allocation2 + $0x290] sm:$0xff]  ;;  %v241_v1 = vld [vmem:[#allocation2 + $0x288] sm:$0xff] }
  0x2b   :  { %218 = vmatpush.msrb.mxu0 %v211_v10  ;;  %260 = vmatpush.msrb.mxu1 %v253_v34  ;;  %v290_v10 = vld [vmem:[#allocation2 + $0x340] sm:$0xff] }
  0x2c   :  { %147 = vmatpush.msra.mxu2 %v118_v2  ;;  %185 = vmatpush.msra.mxu3 %v156_v3  ;;  %v240_v2 = vld [vmem:[#allocation2 + $0x280] sm:$0xff]  ;;  %v297_v3 = vld [vmem:[#allocation2 + $0x378] sm:$0xff] }
  0x2d   :  { %219 = vmatpush.msrb.mxu0 %v210_v11  ;;  %261 = vmatpush.msrb.mxu1 %v252_v35  ;;  %v386_v11 = vld [vmem:[%s495_s2 + $0x4] ss:$0 sm:$0xff]  ;;  %v388_v34 = vld [vmem:[%s495_s2 + $0x6] ss:$0 sm:$0xff] }
  0x2e   :  { %148 = vmatpush.msra.mxu2 %v117_v4  ;;  %186 = vmatpush.msra.mxu3 %v155_v5  ;;  %v296_v4 = vld [vmem:[#allocation2 + $0x370] sm:$0xff]  ;;  %v295_v5 = vld [vmem:[#allocation2 + $0x368] sm:$0xff] }
  0x2f   :  { %220 = vmatpush.msrb.mxu0 %v209_v12  ;;  %262 = vmatpush.msrb.mxu1 %v251_v36 }
  0x30   :  { %149 = vmatpush.msra.mxu2 %v116_v6  ;;  %187 = vmatpush.msra.mxu3 %v154_v7  ;;  %v294_v6 = vld [vmem:[#allocation2 + $0x360] sm:$0xff]  ;;  %v293_v7 = vld [vmem:[#allocation2 + $0x358] sm:$0xff] }
  0x31   :  { %221 = vmatpush.msrb.mxu0 %v208_v13  ;;  %263 = vmatpush.msrb.mxu1 %v250_v37 }
  0x32   :  { %300 = vmatpush.msrb.mxu2 %v297_v3 }
  0x33   :  { %222 = vmatpush.msrb.mxu0 %v207_v21  ;;  %264 = vmatpush.msrb.mxu1 %v249_v39  ;;  %v286_v21 = vld [vmem:[#allocation2 + $0x320] sm:$0xff] }
  0x34   :  { %301 = vmatpush.msrb.mxu2 %v296_v4 }
  0x35   :  { %223 = vmatpush.msrb.mxu0 %v206_v22  ;;  %265 = vmatpush.msrb.mxu1 %v248_v41  ;;  %v285_v22 = vld [vmem:[#allocation2 + $0x318] sm:$0xff] }
  0x36   :  { %302 = vmatpush.msrb.mxu2 %v295_v5 }
  0x37   :  { %224 = vmatpush.msrb.mxu0 %v205_v23  ;;  %266 = vmatpush.msrb.mxu1 %v247_v59  ;;  %v284_v23 = vld [vmem:[#allocation2 + $0x310] sm:$0xff] }
  0x38   :  { %303 = vmatpush.msrb.mxu2 %v294_v6 }
  0x39   :  { %225 = vmatpush.msrb.mxu0 %v204_v25  ;;  %267 = vmatpush.msrb.mxu1 %v246_v60  ;;  %v283_v25 = vld [vmem:[#allocation2 + $0x308] sm:$0xff] }
  0x3a   :  { %304 = vmatpush.msrb.mxu2 %v293_v7 }
  0x3b   :  { %226 = vmatpush.msrb.mxu0 %v203_v26  ;;  %268 = vmatpush.msrb.mxu1 %v245_v61  ;;  %v282_v26 = vld [vmem:[#allocation2 + $0x300] sm:$0xff] }
  0x3c   :  { %305 = vmatpush.msrb.mxu2 %v292_v8 }
  0x3d   :  { %227 = vmatpush.msrb.mxu0 %v202_v27  ;;  %269 = vmatpush.msrb.mxu1 %v244_v62  ;;  %v387_v27 = vld [vmem:[%s495_s2 + $0x5] ss:$0 sm:$0xff] }
  0x3e   :  { %306 = vmatpush.msrb.mxu2 %v291_v9 }
  0x3f   :  { %228 = vmatpush.msrb.mxu0 %v201_v28  ;;  %270 = vmatpush.msrb.mxu1 %v243_v63 }
  0x40   :  { %307 = vmatpush.msrb.mxu2 %v290_v10 }
  0x41   :  { %229 = vmatpush.msrb.mxu0 %v200_v29  ;;  %271 = vmatpush.msrb.mxu1 %v242_v0 }
  0x43   :  { %230 = vmatpush.msrb.mxu0 %v199_v30  ;;  %272 = vmatpush.msrb.mxu1 %v241_v1 }
  0x45   :  { %231 = vmatpush.msrb.mxu0 %v198_v31  ;;  %273 = vmatpush.msrb.mxu1 %v240_v2 }
  0xa2   :  { %v67_v50 = vpop.f32.mrf.mxu0 }
  0xa3   :  { %v68_v51 = vadd.f32 %v382_v49, %v67_v50 }
  0xa5   :  { %v70_v52 = vmul.f32 0.5, %v68_v51 }
  0xa7   :  { %389 = vtanh.f32 %v70_v52 }
  0xad   :  { %v390_v53 = vpop.eup %389 }
  0xae   :  { %v72_v54 = vmul.f32 0.5, %v390_v53 }
  0xb0   :  { %v73_v55 = vadd.f32 0.5, %v72_v54 }
  0xb2   :  { %108 = vmatmul.f32.vlgmr.msra.gmra.mxu1 %v73_v55 }
 0x12f   :  { %v109_v15 = vpop.f32.mrf.mxu1 }
 0x130   :  { %v110_v16 = vadd.f32 %v383_v14, %v109_v15 }
 0x132   :  { %v112_v17 = vmul.f32 0.5, %v110_v16 }
 0x134   :  { %391 = vtanh.f32 %v112_v17 }
 0x13a   :  { %v392_v18 = vpop.eup %391 }
 0x13b   :  { %v114_v19 = vmul.f32 0.5, %v392_v18  ;;  %v289_v18 = vld [vmem:[#allocation2 + $0x338] sm:$0xff] }
 0x13c   :  { %308 = vmatpush.msrb.mxu2 %v289_v18 }
 0x13d   :  { %v115_v20 = vadd.f32 0.5, %v114_v19  ;;  %v288_v19 = vld [vmem:[#allocation2 + $0x330] sm:$0xff] }
 0x13e   :  { %309 = vmatpush.msrb.mxu2 %v288_v19 }
 0x13f   :  { %150 = vmatmul.f32.vlgmr.msra.gmra.mxu2 %v115_v20  ;;  %188 = vmatmul.f32.vlgmr.msra.gmra.mxu3 %v115_v20  ;;  %v287_v20 = vld [vmem:[#allocation2 + $0x328] sm:$0xff] }
 0x140   :  { %310 = vmatpush.msrb.mxu2 %v287_v20 }
 0x142   :  { %311 = vmatpush.msrb.mxu2 %v286_v21 }
 0x144   :  { %312 = vmatpush.msrb.mxu2 %v285_v22 }
 0x146   :  { %313 = vmatpush.msrb.mxu2 %v284_v23 }
 0x148   :  { %314 = vmatpush.msrb.mxu2 %v283_v25 }
 0x14a   :  { %315 = vmatpush.msrb.mxu2 %v282_v26 }
 0x1c2   :  { %v189_v40 = vpop.f32.mrf.mxu3  ;;  %v151_v47 = vpop.f32.mrf.mxu2 }
 0x1c3   :  { %v190_v42 = vadd.f32 %v385_v38, %v189_v40  ;;  %v152_v50 = vadd.f32 %v384_v45, %v151_v47  ;;  %v320_v38 = vlaneseq }
 0x1c5   :  { %v192_v43 = vmul.f32 0.5, %v190_v42  ;;  %v331_v56 = vmul.f32 %v152_v50, %v152_v50  ;;  %v321_v40 = vand.u32 127, %v320_v38 }
 0x1c7   :  { %393 = vtanh.f32 %v192_v43  ;;  %vm333_vm0 = vcmp.lt.s32.totalorder %v321_v40, 8  ;;  %vm363_vm3 = vcmp.eq.s32.totalorder %v321_v40, 2  ;;  %vm362_vm4 = vcmp.eq.s32.totalorder %v321_v40, 1 }
 0x1c8   :  { %vm361_vm5 = vcmp.eq.s32.totalorder %v321_v40, 0 }
 0x1cd   :  { %v394_v44 = vpop.eup %393 }
 0x1ce   :  { %v194_v46 = vmul.f32 0.5, %v394_v44 }
 0x1d0   :  { %v195_v49 = vadd.f32 0.5, %v194_v46 }
 0x1d2   :  { %v196_v51 = vmul.f32 %v195_v49, %v31_v48  ;;  %395 = vlog2.f32 %v195_v49  ;;  %v373_v54 = vadd.f32 -1.0, %v195_v49  ;;  %v432_v49 = vmov 8.0  }
 0x1d4   :  { %v197_v52 = vadd.f32 %v196_v51, %v152_v50 }
 0x1d6   :  { %232 = vmatmul.f32.vlgmr.msrb.gmra.mxu0 %v197_v52 }
 0x1d8   :  { %v396_v53 = vpop.eup %395 }
 0x1d9   :  { %v329_v55 = vmul.f32 0.6931472, %v396_v53 }
 0x1db   :  { %v330_v57 = vsub.f32 %v373_v54, %v329_v55 }
 0x1dd   :  { %v477_v58 = vadd.f32 %v331_v56, %v330_v57 }
 0x1df   :  { %v334_v41 = vsel %vm333_vm0, %v477_v58, 0.0 }
 0x253   :  { %v233_v12 = vpop.f32.mrf.mxu0 }
 0x254   :  { %v234_v13 = vadd.f32 %v386_v11, %v233_v12 }
 0x256   :  { %v236_v14 = vmul.f32 0.5, %v234_v13 }
 0x258   :  { %397 = vtanh.f32 %v236_v14 }
 0x25e   :  { %v398_v15 = vpop.eup %397 }
 0x25f   :  { %v238_v16 = vmul.f32 0.5, %v398_v15 }
 0x261   :  { %v239_v17 = vadd.f32 0.5, %v238_v16 }
 0x263   :  { %274 = vmatmul.f32.vlgmr.msrb.gmra.mxu1 %v239_v17 }
 0x2e0   :  { %v275_v28 = vpop.f32.mrf.mxu1 }
 0x2e1   :  { %v276_v29 = vadd.f32 %v387_v27, %v275_v28 }
 0x2e3   :  { %v278_v30 = vmul.f32 0.5, %v276_v29 }
 0x2e5   :  { %399 = vtanh.f32 %v278_v30 }
 0x2e6   :  { %401 = vrcp.f32 %v432_v49 }
 0x2eb   :  { %v400_v31 = vpop.eup %399 }
 0x2ec   :  { %v280_v32 = vmul.f32 0.5, %v400_v31 }
 0x2ee   :  { %v281_v33 = vadd.f32 0.5, %v280_v32 }
 0x2f0   :  { %316 = vmatmul.f32.vlgmr.msrb.gmra.mxu2 %v281_v33 }
 0x373   :  { %v317_v35 = vpop.f32.mrf.mxu2 }
 0x374   :  { %v318_v36 = vadd.f32 %v388_v34, %v317_v35 }
 0x376   :  { %v322_v37 = vsub.f32 %v318_v36, %v459_v24  ;;  %v402_v24 = vpop.eup %401 }
 0x377   :  { %v352_v50 = vmul.f32 8.0, %v402_v24  ;;  %vm356_vm2 = vweird.f32 %v402_v24 }
 0x378   :  { %v323_v39 = vmul.f32 %v322_v37, %v322_v37 }
 0x379   :  { %v353_v51 = vsub.f32 1.0, %v352_v50 }
 0x37a   :  { %324 = vadd.xlane.f32.xlu0 %v323_v39 }
 0x37b   :  { %v354_v55 = vmul.f32 %v402_v24, %v353_v51 }
 0x37d   :  { %v355_v58 = vadd.f32 %v402_v24, %v354_v55 }
 0x37f   :  { %v357_v61 = vsel %vm356_vm2, %v402_v24, %v355_v58 }
 0x382   :  { %335 = vadd.xlane.f32.xlu0 %v334_v41 }
 0x3ed   :  { %v325_v42 = vpop.xlane.xlu0 %324 }
 0x3ee   :  { %v326_v43 = vmul.f32 0.0625, %v325_v42 }
 0x3f0   :  { %v338_v45 = vmul.f32 0.5, %v326_v43 }
 0x3f5   :  { %v336_v44 = vpop.xlane.xlu0 %335 }
 0x3f6   :  { %v337_v46 = vmul.f32 0.5, %v336_v44 }
 0x3f8   :  { %v339_v47 = vadd.f32 %v338_v45, %v337_v46 }
 0x3fa   :  { %v341_v48 = vsel %vm340_vm1, %v339_v47, 0.0 }
 0x3fb   :  { %342 = vadd.xlane.f32.xlu1 %v341_v48 }
 0x46e   :  { %v343_v52 = vpop.xlane.xlu1 %342 }
 0x46f   :  { %v344_v53 = vrot.slane %v343_v52, 4 }
 0x471   :  { %v345_v54 = vadd.f32 %v344_v53, %v343_v52 }
 0x473   :  { %v346_v56 = vrot.slane %v345_v54, 2 }
 0x475   :  { %v347_v57 = vadd.f32 %v346_v56, %v345_v54 }
 0x477   :  { %v348_v59 = vrot.slane %v347_v57, 1 }
 0x479   :  { %v349_v60 = vadd.f32 %v348_v59, %v347_v57 }
 0x47b   :  { %374 = vpush %v349_v60 }
 0x47c   :  { %376 = vpush %v357_v61 }
 0x4ac   :  { %s375_s2 = spop %374 }
 0x4ad   :  { %s377_s8 = spop %376 }
 0x4ae   :  { %s359_s9 = smul.f32 %s377_s8, %s375_s2 }
 0x4b0   :  { %v360_v62 = vstv %s359_s9 }
 0x4b1   :  { %v364_v63 = vsel %vm363_vm3, %v360_v62, 0.0 }
 0x4b2   :  { %v365_v0 = vsel %vm362_vm4, %v337_v46, %v364_v63 }
 0x4b3   :  { %v366_v1 = vsel %vm361_vm5, %v326_v43, %v365_v0 }
 0x4b4   :  { %367 = vst [vmem:[%s496_s3] sm:$0xff] %v366_v1 }
 0x4b5   :  { %372 = vsyncpa [#allocation3], 1 }

</bundles_post_ra>
